<compile_context>
chip_gen: v7x
topology: tpu7x:2x2x1
jax: 0.10.0
libtpu: 0.0.40
codegen_flags: <defaults>
</compile_context>

<pallas_src>
import functools
import math

import jax
import jax.numpy as jnp
import numpy as np
from jax.experimental import pallas as pl
from jax.experimental.pallas import tpu as pltpu

_SQRT_HALF = 0.7071067811865476
_GN_EPS = 1e-5
# Abramowitz & Stegun 7.1.26 erf constants (max abs err ~1.5e-7).
_A1, _A2, _A3, _A4, _A5 = 0.254829592, -0.284496736, 1.421413741, -1.453152027, 1.061405429
_P = 0.3275911
_MAX_TILE_LANES = 2048  # target lane width per grid step


def _gelu(x):
    """erf-based GELU matching torch.nn.GELU() to ~1e-6 (divide + exp go to the EUP)."""
    z = x * _SQRT_HALF
    za = jnp.abs(z)
    t = 1.0 / (1.0 + _P * za)            # f32 divide -> EUP reciprocal + refinement on TPU
    poly = ((((_A5 * t + _A4) * t + _A3) * t + _A2) * t + _A1) * t
    erf = jnp.where(z < 0, -1.0, 1.0) * (1.0 - poly * jnp.exp(-za * za))
    return 0.5 * x * (1.0 + erf)
    # TODO(synk): tanh-GELU variant would shave VALU ops but deviates ~1e-3 from exact erf.


def _double_conv_kernel(x_ref, w1_ref, g1_ref, b1_ref, w2_ref, g2_ref, b2_ref,
                        m_ref, s_ref, st_ref, out_ref, *,
                        seg_len, real_len, c_mid, c_out, residual):
    x = x_ref[...]                       # (C_in_pad, NT) f32, NT = Bt * seg_len
    masks = m_ref[...]                   # (3, NT): [not_first, not_last, valid] as 0/1 f32
    nf = masks[0:1, :]
    nl = masks[1:2, :]
    valid = masks[2:3, :]
    need_valid = seg_len != real_len     # static: only when L was padded up to seg_len
    sel = s_ref[...]                     # (NT, Bt) lane -> batch-segment selector
    sel_t = st_ref[...]                  # (Bt, NT)

    def conv3(v, w_ref):
        # Conv1d(k=3, pad=1, no bias): three accumulating MXU dots (no concat copy).
        # Shifted operands via lane slice+concat; segment-seam lanes zeroed by the masks
        # (== PyTorch's zero padding; also isolates batch elements folded into lanes).
        v_m1 = nf * jnp.concatenate([v[:, :1], v[:, :-1]], axis=1)   # v[:, l-1]
        v_p1 = nl * jnp.concatenate([v[:, 1:], v[:, -1:]], axis=1)   # v[:, l+1]
        acc = jnp.dot(w_ref[0], v_m1, preferred_element_type=jnp.float32)
        acc = acc + jnp.dot(w_ref[1], v, preferred_element_type=jnp.float32)
        acc = acc + jnp.dot(w_ref[2], v_p1, preferred_element_type=jnp.float32)
        return acc

    def groupnorm1(h, gamma, beta, c_real):
        # GroupNorm(num_groups=1): per-sample stats over (c_real, real_len). Batch lives in
        # the lane dim, so stats go lanes -> Bt segments and back with two small MXU dots.
        # Padded channel rows are exactly zero and length-pad lanes are zeroed here, so sums
        # only see real elements; divide by the real element count.
        if need_valid:
            h = h * valid
        inv_n = 1.0 / float(c_real * real_len)
        stats = jnp.concatenate(
            [jnp.sum(h, axis=0, keepdims=True),
             jnp.sum(h * h, axis=0, keepdims=True)], axis=0)               # (2, NT)
        seg = jnp.dot(stats, sel, preferred_element_type=jnp.float32)      # (2, Bt)
        mean = seg[0:1, :] * inv_n
        var = jnp.maximum(seg[1:2, :] * inv_n - mean * mean, 0.0)
        mi = jnp.concatenate([mean, jax.lax.rsqrt(var + _GN_EPS)], axis=0)  # (2, Bt)
        lanes = jnp.dot(mi, sel_t, preferred_element_type=jnp.float32)      # (2, NT)
        return (h - lanes[0:1, :]) * lanes[1:2, :] * gamma + beta

    h = conv3(x, w1_ref)
    h = groupnorm1(h, g1_ref[...], b1_ref[...], c_mid)
    h = _gelu(h)
    h = conv3(h, w2_ref)
    h = groupnorm1(h, g2_ref[...], b2_ref[...], c_out)
    if residual:
        h = _gelu(x + h)
    out_ref[...] = h                     # single contiguous, lane-dense (128-multiple) store


def _round_up(v, m):
    return ((v + m - 1) // m) * m


def _choose_tiling(batch, length):
    """Pick (seg_len, bt): padded per-sample length and batch elements per grid step, such
    that bt*seg_len (the lane width of one tile) is always a multiple of 128."""
    align = 128 // math.gcd(length, 128)
    if align * length <= _MAX_TILE_LANES:
        seg_len, bt_align = length, align                 # no length padding needed
    else:
        seg_len, bt_align = _round_up(length, 128), 1     # pad L so any bt stays lane-dense
    # Target ~2048 lanes per grid step (amortize per-step overhead, unmasked stores).
    bt_target = max(bt_align, (_MAX_TILE_LANES // seg_len) // bt_align * bt_align)
    bt_cover = _round_up(max(batch, 1), bt_align)         # bt covering the batch in one step
    bt = min(bt_target, bt_cover)
    # Prefer >= 2 grid steps when the batch allows it (v7x dual TensorCores + DMA overlap).
    if bt >= bt_cover and batch > bt_align:
        half = (bt_cover // 2) // bt_align * bt_align
        if half >= bt_align:
            bt = half
    return seg_len, bt


@functools.partial(jax.jit, static_argnames=("residual",))
def double_conv(x, params, *, residual=False):
    """x: (B, C_in, L) float32. params = (w1, g1, b1, w2, g2, b2); conv weights stored as
    (3, C_out, C_in) (tap-major), GroupNorm affine params as (C, 1)."""
    w1, g1, b1, w2, g2, b2 = params
    B, C_in, L = x.shape
    _, C_mid, _ = w1.shape
    C_out = w2.shape[1]
    if residual and C_in != C_out:
        raise ValueError("residual DoubleConv requires in_channels == out_channels")

    cip = _round_up(C_in, 8)
    cmp_ = _round_up(C_mid, 8)
    cop = _round_up(C_out, 8)

    seg_len, bt = _choose_tiling(B, L)
    bp = _round_up(B, bt)
    nt = bt * seg_len
    n_steps = bp // bt

    # Fold batch into the lane dimension: (B, C_in, L) -> (cip, bp*seg_len), zero-padded.
    if (bp, cip, seg_len) == (B, C_in, L):
        xp = x.astype(jnp.float32)
    else:
        xp = jnp.zeros((bp, cip, seg_len), jnp.float32).at[:B, :C_in, :L].set(
            x.astype(jnp.float32))
    x_flat = jnp.transpose(xp, (1, 0, 2)).reshape(cip, bp * seg_len)

    def pad_weight(w, co, co_p, ci, ci_p):
        # (3, co, ci) tap-major -> (3, co_p, ci_p); padded output rows are zero so padded
        # activation channels stay exactly zero through the whole pipeline.
        return jnp.zeros((3, co_p, ci_p), jnp.float32).at[:, :co, :ci].set(
            w.astype(jnp.float32))

    def pad_affine(v, c, c_p):
        return jnp.zeros((c_p, 1), jnp.float32).at[:c, :].set(
            v.astype(jnp.float32).reshape(c, 1))

    w1p = pad_weight(w1, C_mid, cmp_, C_in, cip)
    w2p = pad_weight(w2, C_out, cop, C_mid, cmp_)
    g1p, b1p = pad_affine(g1, C_mid, cmp_), pad_affine(b1, C_mid, cmp_)
    g2p, b2p = pad_affine(g2, C_out, cop), pad_affine(b2, C_out, cop)

    # Resident lane masks and per-sample segment selectors: identical for every grid step
    # (tiles always start at segment boundaries), built as host constants.
    pos = np.arange(nt, dtype=np.int64) % seg_len
    masks = jnp.asarray(
        np.stack([pos != 0, pos != (L - 1), pos < L]).astype(np.float32))      # (3, NT)
    seg_id = np.arange(nt, dtype=np.int64) // seg_len
    sel_np = (seg_id[:, None] == np.arange(bt)[None, :]).astype(np.float32)    # (NT, Bt)
    sel = jnp.asarray(sel_np)
    sel_t = jnp.asarray(sel_np.T)

    kernel = functools.partial(_double_conv_kernel, seg_len=seg_len, real_len=L,
                               c_mid=C_mid, c_out=C_out, residual=residual)

    # Rough per-step VMEM estimate (double-buffered act/out tiles, resident weights &
    # selectors, in-kernel temporaries), clamped to [32, 64] MiB (v7x has 64 MiB / TC).
    est_vmem = 4 * (2 * (cip + cop) * nt
                    + 2 * (3 * cmp_ * (cip + cop) + 2 * (cmp_ + cop))
                    + 2 * (2 * nt * bt + 3 * nt)
                    + 4 * max(cip, cmp_, cop) * nt)
    vmem_limit = int(min(64 * 1024 * 1024, max(32 * 1024 * 1024, 2 * est_vmem)))

    out_flat = pl.pallas_call(
        kernel,
        out_shape=jax.ShapeDtypeStruct((cop, bp * seg_len), jnp.float32),
        grid=(n_steps,),
        in_specs=[
            pl.BlockSpec((cip, nt), lambda i: (0, i)),            # activations: lane-tiled
            pl.BlockSpec((3, cmp_, cip), lambda i: (0, 0, 0)),    # conv1 weight (resident)
            pl.BlockSpec((cmp_, 1), lambda i: (0, 0)),
            pl.BlockSpec((cmp_, 1), lambda i: (0, 0)),
            pl.BlockSpec((3, cop, cmp_), lambda i: (0, 0, 0)),    # conv2 weight (resident)
            pl.BlockSpec((cop, 1), lambda i: (0, 0)),
            pl.BlockSpec((cop, 1), lambda i: (0, 0)),
            pl.BlockSpec((3, nt), lambda i: (0, 0)),              # lane masks (resident)
            pl.BlockSpec((nt, bt), lambda i: (0, 0)),             # segment selector (resident)
            pl.BlockSpec((bt, nt), lambda i: (0, 0)),
        ],
        out_specs=pl.BlockSpec((cop, nt), lambda i: (0, i)),
        compiler_params=pltpu.CompilerParams(
            dimension_semantics=("parallel",),                    # batch chunks independent
            vmem_limit_bytes=vmem_limit,
        ),
    )(x_flat, w1p, g1p, b1p, w2p, g2p, b2p, masks, sel, sel_t)

    out = out_flat.reshape(cop, bp, seg_len).transpose(1, 0, 2)
    return out[:B, :C_out, :L]


def make_params(key, c_in, c_mid, c_out):
    """Deterministic synthetic params. Conv weights (3, C_out, C_in); GN affine (C, 1)."""
    k1, k2, k3, k4 = jax.random.split(key, 4)
    w1 = 0.2 * jax.random.normal(k1, (3, c_mid, c_in), jnp.float32)
    w2 = 0.2 * jax.random.normal(k2, (3, c_out, c_mid), jnp.float32)
    g1 = 1.0 + 0.1 * jax.random.normal(k3, (c_mid, 1), jnp.float32)
    b1 = 0.1 * jax.random.normal(k4, (c_mid, 1), jnp.float32)
    g2 = 1.0 + 0.1 * jax.random.normal(k3, (c_out, 1), jnp.float32)
    b2 = 0.1 * jax.random.normal(k4, (c_out, 1), jnp.float32)
    return (w1, g1, b1, w2, g2, b2)


def reference(x, params, *, residual=False):
    """Pure-JAX reference (lax.conv + exact erf GELU) for correctness checking."""
    w1, g1, b1, w2, g2, b2 = params

    def conv(v, w):
        wt = jnp.transpose(w, (1, 2, 0))  # (C_out, C_in, 3) == PyTorch Conv1d layout
        return jax.lax.conv_general_dilated(
            v, wt, window_strides=(1,), padding=((1, 1),),
            dimension_numbers=("NCH", "OIH", "NCH"))

    def gn(v, g, b):
        mean = jnp.mean(v, axis=(1, 2), keepdims=True)
        var = jnp.mean((v - mean) ** 2, axis=(1, 2), keepdims=True)
        return (v - mean) * jax.lax.rsqrt(var + _GN_EPS) * g[None] + b[None]

    def gelu(v):
        return 0.5 * v * (1.0 + jax.lax.erf(v * _SQRT_HALF))

    h = conv(x.astype(jnp.float32), w1)
    h = gn(h, g1, b1)
    h = gelu(h)
    h = conv(h, w2)
    h = gn(h, g2, b2)
    return gelu(x + h) if residual else h


if __name__ == "__main__":
    B, C_IN, L = 2, 4, 16
    C_MID, C_OUT = 8, 8

    key = jax.random.PRNGKey(0)
    kx, kp1, kp2 = jax.random.split(key, 3)
    x = jax.random.normal(kx, (B, C_IN, L), jnp.float32)

    # Non-residual DoubleConv(in=4, out=8) (mid defaults to out=8).
    params_a = make_params(kp1, C_IN, C_MID, C_OUT)
    out_a = jax.block_until_ready(double_conv(x, params_a, residual=False))
    ref_a = reference(x, params_a, residual=False)
    np.testing.assert_allclose(np.asarray(out_a), np.asarray(ref_a), rtol=1e-4, atol=1e-4)

    # Residual DoubleConv(in=4, out=4, mid=8, residual=True).
    params_b = make_params(kp2, C_IN, C_MID, C_IN)
    out_b = jax.block_until_ready(double_conv(x, params_b, residual=True))
    ref_b = reference(x, params_b, residual=True)
    np.testing.assert_allclose(np.asarray(out_b), np.asarray(ref_b), rtol=1e-4, atol=1e-4)

    print("KERNEL_OK")
</pallas_src>

<mosaic_0001>
module attributes {stable_mosaic.version = 11 : i64} {
  func.func @_double_conv_kernel(%arg0: i32, %arg1: memref<8x128xf32, #tpu.memory_space<vmem>>, %arg2: memref<3x8x8xf32, #tpu.memory_space<vmem>>, %arg3: memref<8x1xf32, #tpu.memory_space<vmem>>, %arg4: memref<8x1xf32, #tpu.memory_space<vmem>>, %arg5: memref<3x8x8xf32, #tpu.memory_space<vmem>>, %arg6: memref<8x1xf32, #tpu.memory_space<vmem>>, %arg7: memref<8x1xf32, #tpu.memory_space<vmem>>, %arg8: memref<3x128xf32, #tpu.memory_space<vmem>>, %arg9: memref<128x8xf32, #tpu.memory_space<vmem>>, %arg10: memref<8x128xf32, #tpu.memory_space<vmem>>, %arg11: memref<8x128xf32, #tpu.memory_space<vmem>>) attributes {dimension_semantics = [#tpu.dimension_semantics<parallel>], iteration_bounds = array<i64: 1>, scalar_prefetch = 0 : i64, scratch_operands = 0 : i64, tpu.core_type = #tpu.core_type<tc>, window_params = [{transform_indices = @transform_0, window_bounds = array<i64: 8, 128>}, {pipeline_mode = #tpu.pipeline_mode<synchronous>, transform_indices = @transform_1, window_bounds = array<i64: 3, 8, 8>}, {pipeline_mode = #tpu.pipeline_mode<synchronous>, transform_indices = @transform_2, window_bounds = array<i64: 8, 1>}, {pipeline_mode = #tpu.pipeline_mode<synchronous>, transform_indices = @transform_3, window_bounds = array<i64: 8, 1>}, {pipeline_mode = #tpu.pipeline_mode<synchronous>, transform_indices = @transform_4, window_bounds = array<i64: 3, 8, 8>}, {pipeline_mode = #tpu.pipeline_mode<synchronous>, transform_indices = @transform_5, window_bounds = array<i64: 8, 1>}, {pipeline_mode = #tpu.pipeline_mode<synchronous>, transform_indices = @transform_6, window_bounds = array<i64: 8, 1>}, {pipeline_mode = #tpu.pipeline_mode<synchronous>, transform_indices = @transform_7, window_bounds = array<i64: 3, 128>}, {pipeline_mode = #tpu.pipeline_mode<synchronous>, transform_indices = @transform_8, window_bounds = array<i64: 128, 8>}, {pipeline_mode = #tpu.pipeline_mode<synchronous>, transform_indices = @transform_9, window_bounds = array<i64: 8, 128>}, {transform_indices = @transform_10, window_bounds = array<i64: 8, 128>}]} {
    %c0 = arith.constant 0 : index
    %c0_0 = arith.constant 0 : index
    %0 = vector.load %arg1[%c0, %c0_0] : memref<8x128xf32, #tpu.memory_space<vmem>>, vector<8x128xf32>
    %c0_1 = arith.constant 0 : index
    %c0_2 = arith.constant 0 : index
    %1 = vector.load %arg8[%c0_1, %c0_2] : memref<3x128xf32, #tpu.memory_space<vmem>>, vector<3x128xf32>
    %2 = vector.extract_strided_slice %1 {offsets = [0, 0], sizes = [1, 128], strides = [1, 1]} : vector<3x128xf32> to vector<1x128xf32>
    %3 = vector.extract_strided_slice %1 {offsets = [1, 0], sizes = [1, 128], strides = [1, 1]} : vector<3x128xf32> to vector<1x128xf32>
    %c0_3 = arith.constant 0 : index
    %c0_4 = arith.constant 0 : index
    %4 = vector.load %arg9[%c0_3, %c0_4] : memref<128x8xf32, #tpu.memory_space<vmem>>, vector<128x8xf32>
    %c0_5 = arith.constant 0 : index
    %c0_6 = arith.constant 0 : index
    %5 = vector.load %arg10[%c0_5, %c0_6] : memref<8x128xf32, #tpu.memory_space<vmem>>, vector<8x128xf32>
    %6 = vector.extract_strided_slice %0 {offsets = [0, 0], sizes = [8, 1], strides = [1, 1]} : vector<8x128xf32> to vector<8x1xf32>
    %7 = vector.extract_strided_slice %0 {offsets = [0, 0], sizes = [8, 127], strides = [1, 1]} : vector<8x128xf32> to vector<8x127xf32>
    %8 = tpu.concatenate %6, %7 in 1 : vector<8x1xf32>, vector<8x127xf32> -> vector<8x128xf32>
    %9 = vector.broadcast %2 : vector<1x128xf32> to vector<8x128xf32>
    %10 = arith.mulf %9, %8 : vector<8x128xf32>
    %11 = vector.extract_strided_slice %0 {offsets = [0, 1], sizes = [8, 127], strides = [1, 1]} : vector<8x128xf32> to vector<8x127xf32>
    %12 = vector.extract_strided_slice %0 {offsets = [0, 127], sizes = [8, 1], strides = [1, 1]} : vector<8x128xf32> to vector<8x1xf32>
    %13 = tpu.concatenate %11, %12 in 1 : vector<8x127xf32>, vector<8x1xf32> -> vector<8x128xf32>
    %14 = vector.broadcast %3 : vector<1x128xf32> to vector<8x128xf32>
    %15 = arith.mulf %14, %13 : vector<8x128xf32>
    %c0_7 = arith.constant 0 : index
    %c0_8 = arith.constant 0 : index
    %c0_9 = arith.constant 0 : index
    %16 = vector.load %arg2[%c0_7, %c0_8, %c0_9] : memref<3x8x8xf32, #tpu.memory_space<vmem>>, vector<1x8x8xf32>
    %17 = vector.shape_cast %16 : vector<1x8x8xf32> to vector<8x8xf32>
    %cst = arith.constant dense<0.000000e+00> : vector<8x128xf32>
    %18 = tpu.matmul %17, %10, %cst {dimension_numbers = #tpu.dot_dimension_numbers<[1], [0], [0], [1], [0, 0, 1, 1], [], []>} : vector<8x8xf32>, vector<8x128xf32>, vector<8x128xf32> -> vector<8x128xf32>
    %c1 = arith.constant 1 : index
    %c0_10 = arith.constant 0 : index
    %c0_11 = arith.constant 0 : index
    %19 = vector.load %arg2[%c1, %c0_10, %c0_11] : memref<3x8x8xf32, #tpu.memory_space<vmem>>, vector<1x8x8xf32>
    %20 = vector.shape_cast %19 : vector<1x8x8xf32> to vector<8x8xf32>
    %cst_12 = arith.constant dense<0.000000e+00> : vector<8x128xf32>
    %21 = tpu.matmul %20, %0, %cst_12 {dimension_numbers = #tpu.dot_dimension_numbers<[1], [0], [0], [1], [0, 0, 1, 1], [], []>} : vector<8x8xf32>, vector<8x128xf32>, vector<8x128xf32> -> vector<8x128xf32>
    %22 = arith.addf %18, %21 : vector<8x128xf32>
    %c2 = arith.constant 2 : index
    %c0_13 = arith.constant 0 : index
    %c0_14 = arith.constant 0 : index
    %23 = vector.load %arg2[%c2, %c0_13, %c0_14] : memref<3x8x8xf32, #tpu.memory_space<vmem>>, vector<1x8x8xf32>
    %24 = vector.shape_cast %23 : vector<1x8x8xf32> to vector<8x8xf32>
    %cst_15 = arith.constant dense<0.000000e+00> : vector<8x128xf32>
    %25 = tpu.matmul %24, %15, %cst_15 {dimension_numbers = #tpu.dot_dimension_numbers<[1], [0], [0], [1], [0, 0, 1, 1], [], []>} : vector<8x8xf32>, vector<8x128xf32>, vector<8x128xf32> -> vector<8x128xf32>
    %26 = arith.addf %22, %25 : vector<8x128xf32>
    %c0_16 = arith.constant 0 : index
    %c0_17 = arith.constant 0 : index
    %27 = vector.load %arg3[%c0_16, %c0_17] : memref<8x1xf32, #tpu.memory_space<vmem>>, vector<8x1xf32>
    %c0_18 = arith.constant 0 : index
    %c0_19 = arith.constant 0 : index
    %28 = vector.load %arg4[%c0_18, %c0_19] : memref<8x1xf32, #tpu.memory_space<vmem>>, vector<8x1xf32>
    %cst_20 = arith.constant dense<0.000000e+00> : vector<128xf32>
    %29 = vector.multi_reduction <add>, %26, %cst_20 [0] : vector<8x128xf32> to vector<128xf32>
    %30 = vector.shape_cast %29 : vector<128xf32> to vector<1x128xf32>
    %31 = arith.mulf %26, %26 : vector<8x128xf32>
    %cst_21 = arith.constant dense<0.000000e+00> : vector<128xf32>
    %32 = vector.multi_reduction <add>, %31, %cst_21 [0] : vector<8x128xf32> to vector<128xf32>
    %33 = vector.shape_cast %32 : vector<128xf32> to vector<1x128xf32>
    %34 = tpu.concatenate %30, %33 in 0 : vector<1x128xf32>, vector<1x128xf32> -> vector<2x128xf32>
    %cst_22 = arith.constant dense<0.000000e+00> : vector<2x8xf32>
    %35 = tpu.matmul %34, %4, %cst_22 {dimension_numbers = #tpu.dot_dimension_numbers<[1], [0], [0], [1], [0, 0, 1, 1], [], []>} : vector<2x128xf32>, vector<128x8xf32>, vector<2x8xf32> -> vector<2x8xf32>
    %36 = vector.extract_strided_slice %35 {offsets = [0, 0], sizes = [1, 8], strides = [1, 1]} : vector<2x8xf32> to vector<1x8xf32>
    %cst_23 = arith.constant 7.812500e-03 : f32
    %37 = vector.broadcast %cst_23 : f32 to vector<1x8xf32>
    %38 = arith.mulf %36, %37 : vector<1x8xf32>
    %39 = vector.extract_strided_slice %35 {offsets = [1, 0], sizes = [1, 8], strides = [1, 1]} : vector<2x8xf32> to vector<1x8xf32>
    %cst_24 = arith.constant 7.812500e-03 : f32
    %40 = vector.broadcast %cst_24 : f32 to vector<1x8xf32>
    %41 = arith.mulf %39, %40 : vector<1x8xf32>
    %42 = arith.mulf %38, %38 : vector<1x8xf32>
    %43 = arith.subf %41, %42 : vector<1x8xf32>
    %cst_25 = arith.constant 0.000000e+00 : f32
    %44 = vector.broadcast %cst_25 : f32 to vector<1x8xf32>
    %45 = arith.maximumf %43, %44 : vector<1x8xf32>
    %cst_26 = arith.constant 9.99999974E-6 : f32
    %46 = vector.broadcast %cst_26 : f32 to vector<1x8xf32>
    %47 = arith.addf %45, %46 : vector<1x8xf32>
    %48 = math.rsqrt %47 : vector<1x8xf32>
    %49 = tpu.concatenate %38, %48 in 0 : vector<1x8xf32>, vector<1x8xf32> -> vector<2x8xf32>
    %cst_27 = arith.constant dense<0.000000e+00> : vector<2x128xf32>
    %50 = tpu.matmul %49, %5, %cst_27 {dimension_numbers = #tpu.dot_dimension_numbers<[1], [0], [0], [1], [0, 0, 1, 1], [], []>} : vector<2x8xf32>, vector<8x128xf32>, vector<2x128xf32> -> vector<2x128xf32>
    %51 = vector.extract_strided_slice %50 {offsets = [0, 0], sizes = [1, 128], strides = [1, 1]} : vector<2x128xf32> to vector<1x128xf32>
    %52 = vector.broadcast %51 : vector<1x128xf32> to vector<8x128xf32>
    %53 = arith.subf %26, %52 : vector<8x128xf32>
    %54 = vector.extract_strided_slice %50 {offsets = [1, 0], sizes = [1, 128], strides = [1, 1]} : vector<2x128xf32> to vector<1x128xf32>
    %55 = vector.broadcast %54 : vector<1x128xf32> to vector<8x128xf32>
    %56 = arith.mulf %53, %55 : vector<8x128xf32>
    %57 = vector.broadcast %27 : vector<8x1xf32> to vector<8x128xf32>
    %58 = arith.mulf %56, %57 : vector<8x128xf32>
    %59 = vector.broadcast %28 : vector<8x1xf32> to vector<8x128xf32>
    %60 = arith.addf %58, %59 : vector<8x128xf32>
    %cst_28 = arith.constant 0.707106769 : f32
    %61 = vector.broadcast %cst_28 : f32 to vector<8x128xf32>
    %62 = arith.mulf %60, %61 : vector<8x128xf32>
    %63 = math.absf %62 : vector<8x128xf32>
    %cst_29 = arith.constant 0.327591091 : f32
    %64 = vector.broadcast %cst_29 : f32 to vector<8x128xf32>
    %65 = arith.mulf %64, %63 : vector<8x128xf32>
    %cst_30 = arith.constant 1.000000e+00 : f32
    %66 = vector.broadcast %cst_30 : f32 to vector<8x128xf32>
    %67 = arith.addf %66, %65 : vector<8x128xf32>
    %cst_31 = arith.constant 1.000000e+00 : f32
    %68 = vector.broadcast %cst_31 : f32 to vector<8x128xf32>
    %69 = arith.divf %68, %67 : vector<8x128xf32>
    %cst_32 = arith.constant 1.06140542 : f32
    %70 = vector.broadcast %cst_32 : f32 to vector<8x128xf32>
    %71 = arith.mulf %70, %69 : vector<8x128xf32>
    %cst_33 = arith.constant -1.45315206 : f32
    %72 = vector.broadcast %cst_33 : f32 to vector<8x128xf32>
    %73 = arith.addf %71, %72 : vector<8x128xf32>
    %74 = arith.mulf %73, %69 : vector<8x128xf32>
    %cst_34 = arith.constant 1.42141378 : f32
    %75 = vector.broadcast %cst_34 : f32 to vector<8x128xf32>
    %76 = arith.addf %74, %75 : vector<8x128xf32>
    %77 = arith.mulf %76, %69 : vector<8x128xf32>
    %cst_35 = arith.constant -0.284496725 : f32
    %78 = vector.broadcast %cst_35 : f32 to vector<8x128xf32>
    %79 = arith.addf %77, %78 : vector<8x128xf32>
    %80 = arith.mulf %79, %69 : vector<8x128xf32>
    %cst_36 = arith.constant 0.254829586 : f32
    %81 = vector.broadcast %cst_36 : f32 to vector<8x128xf32>
    %82 = arith.addf %80, %81 : vector<8x128xf32>
    %83 = arith.mulf %82, %69 : vector<8x128xf32>
    %cst_37 = arith.constant 0.000000e+00 : f32
    %84 = vector.broadcast %cst_37 : f32 to vector<8x128xf32>
    %85 = arith.cmpf olt, %62, %84 : vector<8x128xf32>
    %cst_38 = arith.constant -1.000000e+00 : f32
    %cst_39 = arith.constant 1.000000e+00 : f32
    %86 = vector.broadcast %cst_38 : f32 to vector<8x128xf32>
    %87 = vector.broadcast %cst_39 : f32 to vector<8x128xf32>
    %88 = arith.select %85, %86, %87 : vector<8x128xi1>, vector<8x128xf32>
    %cst_40 = arith.constant 0.000000e+00 : f32
    %89 = vector.broadcast %cst_40 : f32 to vector<8x128xf32>
    %90 = arith.subf %89, %63 : vector<8x128xf32>
    %91 = arith.mulf %90, %63 : vector<8x128xf32>
    %92 = math.exp %91 : vector<8x128xf32>
    %93 = arith.mulf %83, %92 : vector<8x128xf32>
    %cst_41 = arith.constant 1.000000e+00 : f32
    %94 = vector.broadcast %cst_41 : f32 to vector<8x128xf32>
    %95 = arith.subf %94, %93 : vector<8x128xf32>
    %96 = arith.mulf %88, %95 : vector<8x128xf32>
    %cst_42 = arith.constant 5.000000e-01 : f32
    %97 = vector.broadcast %cst_42 : f32 to vector<8x128xf32>
    %98 = arith.mulf %97, %60 : vector<8x128xf32>
    %cst_43 = arith.constant 1.000000e+00 : f32
    %99 = vector.broadcast %cst_43 : f32 to vector<8x128xf32>
    %100 = arith.addf %99, %96 : vector<8x128xf32>
    %101 = arith.mulf %98, %100 : vector<8x128xf32>
    %102 = vector.extract_strided_slice %101 {offsets = [0, 0], sizes = [8, 1], strides = [1, 1]} : vector<8x128xf32> to vector<8x1xf32>
    %103 = vector.extract_strided_slice %101 {offsets = [0, 0], sizes = [8, 127], strides = [1, 1]} : vector<8x128xf32> to vector<8x127xf32>
    %104 = tpu.concatenate %102, %103 in 1 : vector<8x1xf32>, vector<8x127xf32> -> vector<8x128xf32>
    %105 = vector.broadcast %2 : vector<1x128xf32> to vector<8x128xf32>
    %106 = arith.mulf %105, %104 : vector<8x128xf32>
    %107 = vector.extract_strided_slice %101 {offsets = [0, 1], sizes = [8, 127], strides = [1, 1]} : vector<8x128xf32> to vector<8x127xf32>
    %108 = vector.extract_strided_slice %101 {offsets = [0, 127], sizes = [8, 1], strides = [1, 1]} : vector<8x128xf32> to vector<8x1xf32>
    %109 = tpu.concatenate %107, %108 in 1 : vector<8x127xf32>, vector<8x1xf32> -> vector<8x128xf32>
    %110 = vector.broadcast %3 : vector<1x128xf32> to vector<8x128xf32>
    %111 = arith.mulf %110, %109 : vector<8x128xf32>
    %c0_44 = arith.constant 0 : index
    %c0_45 = arith.constant 0 : index
    %c0_46 = arith.constant 0 : index
    %112 = vector.load %arg5[%c0_44, %c0_45, %c0_46] : memref<3x8x8xf32, #tpu.memory_space<vmem>>, vector<1x8x8xf32>
    %113 = vector.shape_cast %112 : vector<1x8x8xf32> to vector<8x8xf32>
    %cst_47 = arith.constant dense<0.000000e+00> : vector<8x128xf32>
    %114 = tpu.matmul %113, %106, %cst_47 {dimension_numbers = #tpu.dot_dimension_numbers<[1], [0], [0], [1], [0, 0, 1, 1], [], []>} : vector<8x8xf32>, vector<8x128xf32>, vector<8x128xf32> -> vector<8x128xf32>
    %c1_48 = arith.constant 1 : index
    %c0_49 = arith.constant 0 : index
    %c0_50 = arith.constant 0 : index
    %115 = vector.load %arg5[%c1_48, %c0_49, %c0_50] : memref<3x8x8xf32, #tpu.memory_space<vmem>>, vector<1x8x8xf32>
    %116 = vector.shape_cast %115 : vector<1x8x8xf32> to vector<8x8xf32>
    %cst_51 = arith.constant dense<0.000000e+00> : vector<8x128xf32>
    %117 = tpu.matmul %116, %101, %cst_51 {dimension_numbers = #tpu.dot_dimension_numbers<[1], [0], [0], [1], [0, 0, 1, 1], [], []>} : vector<8x8xf32>, vector<8x128xf32>, vector<8x128xf32> -> vector<8x128xf32>
    %118 = arith.addf %114, %117 : vector<8x128xf32>
    %c2_52 = arith.constant 2 : index
    %c0_53 = arith.constant 0 : index
    %c0_54 = arith.constant 0 : index
    %119 = vector.load %arg5[%c2_52, %c0_53, %c0_54] : memref<3x8x8xf32, #tpu.memory_space<vmem>>, vector<1x8x8xf32>
    %120 = vector.shape_cast %119 : vector<1x8x8xf32> to vector<8x8xf32>
    %cst_55 = arith.constant dense<0.000000e+00> : vector<8x128xf32>
    %121 = tpu.matmul %120, %111, %cst_55 {dimension_numbers = #tpu.dot_dimension_numbers<[1], [0], [0], [1], [0, 0, 1, 1], [], []>} : vector<8x8xf32>, vector<8x128xf32>, vector<8x128xf32> -> vector<8x128xf32>
    %122 = arith.addf %118, %121 : vector<8x128xf32>
    %c0_56 = arith.constant 0 : index
    %c0_57 = arith.constant 0 : index
    %123 = vector.load %arg6[%c0_56, %c0_57] : memref<8x1xf32, #tpu.memory_space<vmem>>, vector<8x1xf32>
    %c0_58 = arith.constant 0 : index
    %c0_59 = arith.constant 0 : index
    %124 = vector.load %arg7[%c0_58, %c0_59] : memref<8x1xf32, #tpu.memory_space<vmem>>, vector<8x1xf32>
    %cst_60 = arith.constant dense<0.000000e+00> : vector<128xf32>
    %125 = vector.multi_reduction <add>, %122, %cst_60 [0] : vector<8x128xf32> to vector<128xf32>
    %126 = vector.shape_cast %125 : vector<128xf32> to vector<1x128xf32>
    %127 = arith.mulf %122, %122 : vector<8x128xf32>
    %cst_61 = arith.constant dense<0.000000e+00> : vector<128xf32>
    %128 = vector.multi_reduction <add>, %127, %cst_61 [0] : vector<8x128xf32> to vector<128xf32>
    %129 = vector.shape_cast %128 : vector<128xf32> to vector<1x128xf32>
    %130 = tpu.concatenate %126, %129 in 0 : vector<1x128xf32>, vector<1x128xf32> -> vector<2x128xf32>
    %cst_62 = arith.constant dense<0.000000e+00> : vector<2x8xf32>
    %131 = tpu.matmul %130, %4, %cst_62 {dimension_numbers = #tpu.dot_dimension_numbers<[1], [0], [0], [1], [0, 0, 1, 1], [], []>} : vector<2x128xf32>, vector<128x8xf32>, vector<2x8xf32> -> vector<2x8xf32>
    %132 = vector.extract_strided_slice %131 {offsets = [0, 0], sizes = [1, 8], strides = [1, 1]} : vector<2x8xf32> to vector<1x8xf32>
    %cst_63 = arith.constant 7.812500e-03 : f32
    %133 = vector.broadcast %cst_63 : f32 to vector<1x8xf32>
    %134 = arith.mulf %132, %133 : vector<1x8xf32>
    %135 = vector.extract_strided_slice %131 {offsets = [1, 0], sizes = [1, 8], strides = [1, 1]} : vector<2x8xf32> to vector<1x8xf32>
    %cst_64 = arith.constant 7.812500e-03 : f32
    %136 = vector.broadcast %cst_64 : f32 to vector<1x8xf32>
    %137 = arith.mulf %135, %136 : vector<1x8xf32>
    %138 = arith.mulf %134, %134 : vector<1x8xf32>
    %139 = arith.subf %137, %138 : vector<1x8xf32>
    %cst_65 = arith.constant 0.000000e+00 : f32
    %140 = vector.broadcast %cst_65 : f32 to vector<1x8xf32>
    %141 = arith.maximumf %139, %140 : vector<1x8xf32>
    %cst_66 = arith.constant 9.99999974E-6 : f32
    %142 = vector.broadcast %cst_66 : f32 to vector<1x8xf32>
    %143 = arith.addf %141, %142 : vector<1x8xf32>
    %144 = math.rsqrt %143 : vector<1x8xf32>
    %145 = tpu.concatenate %134, %144 in 0 : vector<1x8xf32>, vector<1x8xf32> -> vector<2x8xf32>
    %cst_67 = arith.constant dense<0.000000e+00> : vector<2x128xf32>
    %146 = tpu.matmul %145, %5, %cst_67 {dimension_numbers = #tpu.dot_dimension_numbers<[1], [0], [0], [1], [0, 0, 1, 1], [], []>} : vector<2x8xf32>, vector<8x128xf32>, vector<2x128xf32> -> vector<2x128xf32>
    %147 = vector.extract_strided_slice %146 {offsets = [0, 0], sizes = [1, 128], strides = [1, 1]} : vector<2x128xf32> to vector<1x128xf32>
    %148 = vector.broadcast %147 : vector<1x128xf32> to vector<8x128xf32>
    %149 = arith.subf %122, %148 : vector<8x128xf32>
    %150 = vector.extract_strided_slice %146 {offsets = [1, 0], sizes = [1, 128], strides = [1, 1]} : vector<2x128xf32> to vector<1x128xf32>
    %151 = vector.broadcast %150 : vector<1x128xf32> to vector<8x128xf32>
    %152 = arith.mulf %149, %151 : vector<8x128xf32>
    %153 = vector.broadcast %123 : vector<8x1xf32> to vector<8x128xf32>
    %154 = arith.mulf %152, %153 : vector<8x128xf32>
    %155 = vector.broadcast %124 : vector<8x1xf32> to vector<8x128xf32>
    %156 = arith.addf %154, %155 : vector<8x128xf32>
    %c0_68 = arith.constant 0 : index
    %c0_69 = arith.constant 0 : index
    %157 = vector.load %arg11[%c0_68, %c0_69] : memref<8x128xf32, #tpu.memory_space<vmem>>, vector<8x128xf32>
    tpu.vector_store %arg11[%c0_68, %c0_69], %156 {strides = array<i32>} : memref<8x128xf32, #tpu.memory_space<vmem>>, vector<8x128xf32>,
    return
  }
  func.func @transform_0(%arg0: i32) -> (i32, i32) {
    %c0_i32 = arith.constant 0 : i32
    %c0_i32_0 = arith.constant 0 : i32
    return %c0_i32, %arg0 : i32, i32
  }
  func.func @transform_1(%arg0: i32) -> (i32, i32, i32) {
    %c0_i32 = arith.constant 0 : i32
    %c0_i32_0 = arith.constant 0 : i32
    %c0_i32_1 = arith.constant 0 : i32
    %c0_i32_2 = arith.constant 0 : i32
    return %c0_i32, %c0_i32_0, %c0_i32_1 : i32, i32, i32
  }
  func.func @transform_2(%arg0: i32) -> (i32, i32) {
    %c0_i32 = arith.constant 0 : i32
    %c0_i32_0 = arith.constant 0 : i32
    %c0_i32_1 = arith.constant 0 : i32
    return %c0_i32, %c0_i32_0 : i32, i32
  }
  func.func @transform_3(%arg0: i32) -> (i32, i32) {
    %c0_i32 = arith.constant 0 : i32
    %c0_i32_0 = arith.constant 0 : i32
    %c0_i32_1 = arith.constant 0 : i32
    return %c0_i32, %c0_i32_0 : i32, i32
  }
  func.func @transform_4(%arg0: i32) -> (i32, i32, i32) {
    %c0_i32 = arith.constant 0 : i32
    %c0_i32_0 = arith.constant 0 : i32
    %c0_i32_1 = arith.constant 0 : i32
    %c0_i32_2 = arith.constant 0 : i32
    return %c0_i32, %c0_i32_0, %c0_i32_1 : i32, i32, i32
  }
  func.func @transform_5(%arg0: i32) -> (i32, i32) {
    %c0_i32 = arith.constant 0 : i32
    %c0_i32_0 = arith.constant 0 : i32
    %c0_i32_1 = arith.constant 0 : i32
    return %c0_i32, %c0_i32_0 : i32, i32
  }
  func.func @transform_6(%arg0: i32) -> (i32, i32) {
    %c0_i32 = arith.constant 0 : i32
    %c0_i32_0 = arith.constant 0 : i32
    %c0_i32_1 = arith.constant 0 : i32
    return %c0_i32, %c0_i32_0 : i32, i32
  }
  func.func @transform_7(%arg0: i32) -> (i32, i32) {
    %c0_i32 = arith.constant 0 : i32
    %c0_i32_0 = arith.constant 0 : i32
    %c0_i32_1 = arith.constant 0 : i32
    return %c0_i32, %c0_i32_0 : i32, i32
  }
  func.func @transform_8(%arg0: i32) -> (i32, i32) {
    %c0_i32 = arith.constant 0 : i32
    %c0_i32_0 = arith.constant 0 : i32
    %c0_i32_1 = arith.constant 0 : i32
    return %c0_i32, %c0_i32_0 : i32, i32
  }
  func.func @transform_9(%arg0: i32) -> (i32, i32) {
    %c0_i32 = arith.constant 0 : i32
    %c0_i32_0 = arith.constant 0 : i32
    %c0_i32_1 = arith.constant 0 : i32
    return %c0_i32, %c0_i32_0 : i32, i32
  }
  func.func @transform_10(%arg0: i32) -> (i32, i32) {
    %c0_i32 = arith.constant 0 : i32
    %c0_i32_0 = arith.constant 0 : i32
    return %c0_i32, %arg0 : i32, i32
  }
}

</mosaic_0001>

<bundles_post_ra>
// kernel: double_conv.1
= control target key start
LH: loop header
LB: loop body
LE: loop exit
PB: predicated region body
PF: predicated region fallthrough
CT: control target
= control target key end

     0   :  { %vm78_vm0 = vcmask 64512   ;;  %v1197_v1 = vmov 0.0   ;;  %vm1198_vm1 = vmmov 0   ;;  %s1199_s17 = smov 1   ;;  %v60_v3 = vlaneseq  ;;  %s1463_s0 = inlined_call_operand.vmem [shape: f32[8,128], index: 0, kind: input, shape index: {}]   ;;  %s1464_s1 = inlined_call_operand.vmem [shape: f32[3,8,8], index: 1, kind: input, shape index: {}]   ;;  %s1465_s7 = inlined_call_operand.vmem [shape: f32[3,128], index: 7, kind: input, shape index: {}]   ;;  %s1466_s8 = inlined_call_operand.vmem [shape: f32[128,8], index: 8, kind: input, shape index: {}]   ;;  %s1467_s9 = inlined_call_operand.vmem [shape: f32[8,128], index: 9, kind: input, shape index: {}]   ;;  %s1468_s2 = inlined_call_operand.vmem [shape: f32[8,1], index: 2, kind: input, shape index: {}]   ;;  %s1469_s3 = inlined_call_operand.vmem [shape: f32[8,1], index: 3, kind: input, shape index: {}]   ;;  %s1470_s4 = inlined_call_operand.vmem [shape: f32[3,8,8], index: 4, kind: input, shape index: {}]   ;;  %s1471_s6 = inlined_call_operand.vmem [shape: f32[8,1], index: 6, kind: input, shape index: {}]   ;;  %s1472_s5 = inlined_call_operand.vmem [shape: f32[8,1], index: 5, kind: input, shape index: {}]   ;;  %s1473_s10 = inlined_call_operand.vmem [shape: f32[8,128], index: 10, kind: output, shape index: {}]  }
   0x1   :  { %v35_v0 = vld [vmem:[%s1463_s0] sm:$0xff]  ;;  %1014 = vmatprep.subr.mxu1 %v1197_v1  ;;  %1016 = vmatprep.mubr.msk.f32.mxu1 %vm1198_vm1, %v1197_v1  ;;  %v952_v2 = vld [vmem:[%s1464_s1 + $0x8] sm:$0xff]  ;;  %s1200_s0 = smov 127   ;;  %vm58_vm2 = vcmask 7168   ;;  %vm68_vm3 = vcmask 1039360   ;;  %v1201_v19 = vmov 0.0|0.0  }
   0x2   :  { %55 = vrot.lane.b32.xlu0 %v35_v0, %s1199_s17  ;;  %1015 = vmatpush3.msra.mxu1 %v35_v0  ;;  %v61_v4 = vshrl.u32 %v60_v3, 7  ;;  %v36_v6 = vld [vmem:[%s1465_s7] sm:$0x7]  ;;  %v38_v18 = vld [vmem:[%s1466_s8 + $0x8] sm:$0xff]  ;;  %v955_v20 = vld [vmem:[%s1464_s1 + $0x10] sm:$0xff]  ;;  %vm316_vm4 = vcmask 1040384  }
   0x3   :  { %1017 = vmatmul.mubr.msk.f32.vlgmr.msra.gmra.mrb[0].mxu1 %vm78_vm0, %v952_v2  ;;  %1019 = vmatprep.subr.mxu1 %v1197_v1  ;;  %v75_v12 = vld [vmem:[%s1464_s1] sm:$0xff]  ;;  %v39_v22 = vld [vmem:[%s1466_s8 + $0x10] sm:$0xff]  ;;  %v40_v23 = vld [vmem:[%s1466_s8 + $0x18] sm:$0xff]  ;;  %v1202_v60 = vmov 0  }
   0x4   :  { %1021 = vmatprep.mubr.msk.f32.mxu1 %vm1198_vm1, %v1197_v1  ;;  %1064 = vmatprep.subr.mxu0 %v1197_v1  ;;  %v1277_v5 = vsub.s32 0, %v61_v4  ;;  %v1285_v8 = vsub.s32 1, %v61_v4  ;;  %v37_v17 = vld [vmem:[%s1466_s8] sm:$0xff]  ;;  %v1321_v24 = vpack.c.bf16 %v40_v23, %v39_v22  ;;  %v42_v26 = vld [vmem:[%s1466_s8 + $0x28] sm:$0xff]  ;;  %v43_v28 = vld [vmem:[%s1466_s8 + $0x30] sm:$0xff] }
   0x5   :  { %1066 = vmatprep.mubr.msk.f32.mxu0 %vm1198_vm1, %v1197_v1  ;;  %v1311_v21 = vpack.c.bf16 %v38_v18, %v37_v17  ;;  %v41_v25 = vld [vmem:[%s1466_s8 + $0x20] sm:$0xff]  ;;  %v44_v29 = vld [vmem:[%s1466_s8 + $0x38] sm:$0xff]  ;;  %v46_v32 = vld [vmem:[%s1466_s8 + $0x48] sm:$0xff]  ;;  %1187 = vset.pattern.permute.xlu1 %v1202_v60 }
   0x6   :  { %65 = vrot.lane.b32.xlu0 %v35_v0, %s1200_s0  ;;  %v1283_v7 = vrot.slane %v36_v6, %v1277_v5  ;;  %v1293_v13 = vrot.slane %v36_v6, %v1285_v8  ;;  %v1333_v27 = vpack.c.bf16 %v42_v26, %v41_v25  ;;  %v1343_v30 = vpack.c.bf16 %v44_v29, %v43_v28  ;;  %v45_v31 = vld [vmem:[%s1466_s8 + $0x40] sm:$0xff]  ;;  %v47_v34 = vld [vmem:[%s1466_s8 + $0x50] sm:$0xff]  ;;  %v48_v35 = vld [vmem:[%s1466_s8 + $0x58] sm:$0xff] }
   0x7   :  { %v1354_v33 = vpack.c.bf16 %v46_v32, %v45_v31  ;;  %v1364_v36 = vpack.c.bf16 %v48_v35, %v47_v34  ;;  %v49_v37 = vld [vmem:[%s1466_s8 + $0x60] sm:$0xff]  ;;  %v50_v38 = vld [vmem:[%s1466_s8 + $0x68] sm:$0xff]  ;;  %v51_v40 = vld [vmem:[%s1466_s8 + $0x70] sm:$0xff]  ;;  %1188 = vset.pattern.permute.xlu0 %v1202_v60 }
   0x8   :  { %v1374_v39 = vpack.c.bf16 %v50_v38, %v49_v37  ;;  %v52_v41 = vld [vmem:[%s1466_s8 + $0x78] sm:$0xff]  ;;  %v53_v59 = vld [vmem:[%s1467_s9] sm:$0xff] }
   0x9   :  { %v1384_v42 = vpack.c.bf16 %v52_v41, %v51_v40  ;;  %1065 = vmatpush3.msra.mxu0 %v53_v59  ;;  %v301_v61 = vld [vmem:[%s1468_s2] sm:$0xff] }
   0xa   :  { %1069 = vmatprep.subr.mxu0 %v1197_v1  ;;  %483 = vperm.xlu1 %1187, %v301_v61   ;;  %v302_v62 = vld [vmem:[%s1469_s3] sm:$0xff] }
   0xb   :  { %v757_v60 = vld [vmem:[%s1471_s6] sm:$0xff] }
   0xe   :  { %489 = vperm.xlu1 %1187, %v302_v62  }
  0x74   :  { %v56_v9 = vpop.permute.xlu0 %55 }
  0x75   :  { %v59_v10 = vsel %vm58_vm2, %v35_v0, %v56_v9 }
  0x76   :  { %v64_v11 = vmul.f32 %v1283_v7, %v59_v10 }
  0x78   :  { %1020 = vmatpush3.msra.mxu1 %v64_v11  ;;  %v66_v14 = vpop.permute.xlu0 %65 }
  0x79   :  { %1022 = vmatmul.mubr.msk.f32.vlgmr.msra.gmra.mrb[0].mxu1 %vm78_vm0, %v75_v12  ;;  %v69_v15 = vsel %vm68_vm3, %v66_v14, %v35_v0  ;;  %1024 = vmatprep.subr.mxu1 %v1197_v1 }
  0x7a   :  { %v74_v16 = vmul.f32 %v1293_v13, %v69_v15  ;;  %1026 = vmatprep.mubr.msk.f32.mxu1 %vm1198_vm1, %v1197_v1 }
  0x7c   :  { %1025 = vmatpush3.msra.mxu1 %v74_v16 }
  0x7d   :  { %1124 = vmatprep.subr.bf16.mxu1 %v1201_v19 }
  0x81   :  { %1027 = vmatmul.mubr.msk.f32.vlgmr.msra.gmra.mrb[0].mxu1 %vm78_vm0, %v955_v20 }
  0x82   :  { %1126 = vmatpush3.bf16.msra.mxu1 %v1311_v21  ;;  %1061 = vmatprep.mubr.msk.f32.mxu1 %vm1198_vm1, %v1197_v1 }
  0x83   :  { %1127 = vmatprep.subr.bf16.mxu1 %v1201_v19 }
  0x86   :  { %1129 = vmatpush3.bf16.msra.mxu1 %v1321_v24 }
  0x87   :  { %1130 = vmatprep.subr.bf16.mxu1 %v1201_v19 }
  0x89   :  { %v484_v17 = vpop.permute.xlu1 %483 }
  0x8a   :  { %1132 = vmatpush3.bf16.msra.mxu1 %v1333_v27 }
  0x8b   :  { %1133 = vmatprep.subr.bf16.mxu1 %v1201_v19 }
  0x8d   :  { %v490_v25 = vpop.permute.xlu1 %489 }
  0x8e   :  { %1135 = vmatpush3.bf16.msra.mxu1 %v1343_v30 }
  0x8f   :  { %1136 = vmatprep.subr.bf16.mxu1 %v1201_v19 }
  0x92   :  { %1138 = vmatpush3.bf16.msra.mxu1 %v1354_v33 }
  0x93   :  { %1139 = vmatprep.subr.bf16.mxu1 %v1201_v19 }
  0x96   :  { %1141 = vmatpush3.bf16.msra.mxu1 %v1364_v36 }
  0x97   :  { %1142 = vmatprep.subr.bf16.mxu1 %v1201_v19 }
  0x9a   :  { %1144 = vmatpush3.bf16.msra.mxu1 %v1374_v39 }
  0x9b   :  { %1145 = vmatprep.subr.bf16.mxu1 %v1201_v19 }
  0x9e   :  { %1147 = vmatpush3.bf16.msra.mxu1 %v1384_v42 }
  0x9f   :  { %1119 = vmatprep.subr.mxu1 %v1197_v1 }
 0x154   :  { %v296_v43 = vpop.f32.mrb[0].mxu1 }
 0x155   :  { %v303_v44 = vrot.slane %v296_v43, 4  ;;  %v309_v45 = vmul.f32 %v296_v43, %v296_v43  ;;  %v1028_v46 = vpop.f32.mrb[1].mxu1 }
 0x157   :  { %v304_v47 = vadd.f32 %v303_v44, %v296_v43  ;;  %v310_v48 = vrot.slane %v309_v45, 4 }
 0x159   :  { %v305_v49 = vrot.slane %v304_v47, 2  ;;  %v311_v50 = vadd.f32 %v310_v48, %v309_v45 }
 0x15b   :  { %v306_v51 = vadd.f32 %v305_v49, %v304_v47  ;;  %v312_v52 = vrot.slane %v311_v50, 2 }
 0x15d   :  { %v307_v53 = vrot.slane %v306_v51, 1  ;;  %v313_v54 = vadd.f32 %v312_v52, %v311_v50 }
 0x15f   :  { %v314_v55 = vrot.slane %v313_v54, 1  ;;  %v308_v56 = vadd.f32 %v307_v53, %v306_v51  ;;  %v1203_v53 = vmov 1.0  }
 0x161   :  { %v315_v57 = vadd.f32 %v314_v55, %v313_v54 }
 0x163   :  { %v317_v58 = vsel %vm316_vm4, %v308_v56, %v315_v57 }
 0x164   :  { %1062 = vmatmul.mubr.f32.vlgmr.msra.gmra.mrb[2].mxu1 %v317_v58 }
 0x165   :  { %1121 = vmatprep.mubr.msk.f32.mxu1 %vm1198_vm1, %v1197_v1  ;;  %1120 = vmatpush3.msra.mxu1 %v53_v59  ;;  %v958_v59 = vld [vmem:[%s1470_s4 + $0x8] sm:$0xff] }
 0x237   :  { %v384_v63 = vpop.f32.mrb[2].mxu1 }
 0x238   :  { %v388_v0 = vmul.f32 0.0078125, %v384_v63  ;;  %v1063_v2 = vpop.f32.mrb[3].mxu1 }
 0x23a   :  { %v389_v3 = vmul.f32 %v388_v0, %v388_v0 }
 0x23c   :  { %v391_v4 = vrot.slane %v389_v3, 7  ;;  %v531_v3 = vld [vmem:[%s1470_s4] sm:$0xff] }
 0x23e   :  { %v393_v6 = vsub.f32 %v388_v0, %v391_v4 }
 0x240   :  { %v394_v9 = vmax.f32 %v393_v6, 0.0 }
 0x242   :  { %v395_v10 = vadd.f32 1e-05, %v394_v9 }
 0x244   :  { %1189 = vrsqrt.f32 %v395_v10 }
 0x24e   :  { %v1190_v11 = vpop.eup %1189 }
 0x24f   :  { %v397_v12 = vsel %vm316_vm4, %v388_v0, %v1190_v11 }
 0x250   :  { %1067 = vmatmul.mubr.msk.f32.vlgmr.msra.gmra.mrb[0].mxu0 %vm78_vm0, %v397_v12 }
 0x251   :  { %1071 = vmatprep.mubr.msk.f32.mxu0 %vm1198_vm1, %v1197_v1 }
 0x323   :  { %v467_v14 = vpop.f32.mrb[0].mxu0 }
 0x324   :  { %v474_v15 = vrot.slane %v467_v14, %v1277_v5  ;;  %v1068_v16 = vpop.f32.mrb[1].mxu0  ;;  %v479_v20 = vrot.slane %v467_v14, %v1285_v8 }
 0x326   :  { %v475_v18 = vsub.f32 %v296_v43, %v474_v15 }
 0x328   :  { %v480_v22 = vmul.f32 %v479_v20, %v475_v18 }
 0x32a   :  { %v486_v23 = vmul.f32 %v484_v17, %v480_v22 }
 0x32c   :  { %v492_v26 = vadd.f32 %v490_v25, %v486_v23 }
 0x32e   :  { %v493_v28 = vmul.f32 0.70710677, %v492_v26  ;;  %v517_v56 = vmul.f32 0.5, %v492_v26 }
 0x330   :  { %v494_v29 = vand.u32 2147483647, %v493_v28  ;;  %vm508_vm5 = vcmp.lt.f32.partialorder %v493_v28, 0.0 }
 0x331   :  { %v509_v54 = vsel %vm508_vm5, -1.0, %v1203_v53 }
 0x332   :  { %v495_v31 = vmul.f32 0.3275911, %v494_v29  ;;  %v510_v34 = vsub.f32 0.0, %v494_v29 }
 0x334   :  { %v496_v32 = vadd.f32 1.0, %v495_v31  ;;  %v511_v37 = vmul.f32 %v510_v34, %v494_v29 }
 0x336   :  { %1191 = vrcp.f32 %v496_v32  ;;  %v512_v41 = vmul.f32 1.442695, %v511_v37 }
 0x338   :  { %1193 = vpow2.f32 %v512_v41 }
 0x340   :  { %v1192_v35 = vpop.eup %1191 }
 0x341   :  { %v499_v38 = vmul.f32 1.0614054, %v1192_v35 }
 0x342   :  { %v1194_v50 = vpop.eup %1193 }
 0x343   :  { %v500_v40 = vadd.f32 -1.4531521, %v499_v38 }
 0x345   :  { %v501_v44 = vmul.f32 %v1192_v35, %v500_v40 }
 0x347   :  { %v502_v45 = vadd.f32 1.4214138, %v501_v44 }
 0x349   :  { %v503_v43 = vmul.f32 %v1192_v35, %v502_v45 }
 0x34b   :  { %v504_v46 = vadd.f32 -0.28449672, %v503_v43 }
 0x34d   :  { %v505_v47 = vmul.f32 %v1192_v35, %v504_v46 }
 0x34f   :  { %v506_v48 = vadd.f32 0.2548296, %v505_v47 }
 0x351   :  { %v507_v49 = vmul.f32 %v1192_v35, %v506_v48 }
 0x353   :  { %v514_v51 = vmul.f32 %v1194_v50, %v507_v49 }
 0x355   :  { %v515_v52 = vsub.f32 1.0, %v514_v51 }
 0x357   :  { %v516_v55 = vmul.f32 %v515_v52, %v509_v54 }
 0x359   :  { %v518_v57 = vadd.f32 1.0, %v516_v55 }
 0x35b   :  { %v519_v58 = vmul.f32 %v518_v57, %v517_v56 }
 0x35d   :  { %526 = vrot.lane.b32.xlu1 %v519_v58, %s1200_s0  ;;  %521 = vrot.lane.b32.xlu0 %v519_v58, %s1199_s17 }
 0x35e   :  { %1070 = vmatpush3.msra.mxu0 %v519_v58 }
 0x35f   :  { %1072 = vmatmul.mubr.msk.f32.vlgmr.msra.gmra.mrb[2].mxu0 %vm78_vm0, %v958_v59  ;;  %1074 = vmatprep.subr.mxu0 %v1197_v1 }
 0x360   :  { %1076 = vmatprep.mubr.msk.f32.mxu0 %vm1198_vm1, %v1197_v1 }
 0x361   :  { %943 = vperm.xlu1 %1187, %v757_v60  }
 0x3cf   :  { %v527_v61 = vpop.permute.xlu1 %526  ;;  %v522_v62 = vpop.permute.xlu0 %521 }
 0x3d0   :  { %v529_v63 = vsel %vm68_vm3, %v527_v61, %v519_v58  ;;  %v524_v0 = vsel %vm58_vm2, %v519_v58, %v522_v62 }
 0x3d1   :  { %v525_v2 = vmul.f32 %v524_v0, %v1283_v7  ;;  %v530_v4 = vmul.f32 %v529_v63, %v1293_v13  ;;  %v961_v7 = vld [vmem:[%s1470_s4 + $0x10] sm:$0xff] }
 0x3d3   :  { %1075 = vmatpush3.msra.mxu0 %v525_v2 }
 0x3d4   :  { %1077 = vmatmul.mubr.msk.f32.vlgmr.msra.gmra.mrb[2].mxu0 %vm78_vm0, %v531_v3  ;;  %1079 = vmatprep.subr.mxu0 %v1197_v1 }
 0x3d5   :  { %1080 = vmatpush3.msra.mxu0 %v530_v4  ;;  %1081 = vmatprep.mubr.msk.f32.mxu0 %vm1198_vm1, %v1197_v1 }
 0x3d6   :  { %1148 = vmatprep.subr.bf16.mxu0 %v1201_v19 }
 0x3dc   :  { %1082 = vmatmul.mubr.msk.f32.vlgmr.msra.gmra.mrb[2].mxu0 %vm78_vm0, %v961_v7 }
 0x3dd   :  { %1150 = vmatpush3.bf16.msra.mxu0 %v1311_v21  ;;  %1116 = vmatprep.mubr.msk.f32.mxu0 %vm1198_vm1, %v1197_v1 }
 0x3de   :  { %1151 = vmatprep.subr.bf16.mxu0 %v1201_v19 }
 0x3e0   :  { %v944_v41 = vpop.permute.xlu1 %943 }
 0x3e1   :  { %1153 = vmatpush3.bf16.msra.mxu0 %v1321_v24 }
 0x3e2   :  { %1154 = vmatprep.subr.bf16.mxu0 %v1201_v19 }
 0x3e5   :  { %1156 = vmatpush3.bf16.msra.mxu0 %v1333_v27 }
 0x3e6   :  { %1157 = vmatprep.subr.bf16.mxu0 %v1201_v19 }
 0x3e9   :  { %1159 = vmatpush3.bf16.msra.mxu0 %v1343_v30 }
 0x3ea   :  { %1160 = vmatprep.subr.bf16.mxu0 %v1201_v19 }
 0x3ed   :  { %1162 = vmatpush3.bf16.msra.mxu0 %v1354_v33 }
 0x3ee   :  { %1163 = vmatprep.subr.bf16.mxu0 %v1201_v19 }
 0x3f1   :  { %1165 = vmatpush3.bf16.msra.mxu0 %v1364_v36 }
 0x3f2   :  { %1166 = vmatprep.subr.bf16.mxu0 %v1201_v19 }
 0x3f5   :  { %1168 = vmatpush3.bf16.msra.mxu0 %v1374_v39 }
 0x3f6   :  { %1169 = vmatprep.subr.bf16.mxu0 %v1201_v19  ;;  %v756_v19 = vld [vmem:[%s1472_s5] sm:$0xff] }
 0x3f7   :  { %937 = vperm.xlu0 %1188, %v756_v19  }
 0x3f9   :  { %1171 = vmatpush3.bf16.msra.mxu0 %v1384_v42 }
 0x476   :  { %v938_v37 = vpop.permute.xlu0 %937 }
 0x4af   :  { %v751_v1 = vpop.f32.mrb[2].mxu0 }
 0x4b0   :  { %v758_v13 = vrot.slane %v751_v1, 4  ;;  %v764_v21 = vmul.f32 %v751_v1, %v751_v1  ;;  %v1083_v24 = vpop.f32.mrb[3].mxu0 }
 0x4b2   :  { %v759_v27 = vadd.f32 %v758_v13, %v751_v1  ;;  %v765_v30 = vrot.slane %v764_v21, 4 }
 0x4b4   :  { %v760_v6 = vrot.slane %v759_v27, 2  ;;  %v766_v33 = vadd.f32 %v765_v30, %v764_v21 }
 0x4b6   :  { %v761_v9 = vadd.f32 %v760_v6, %v759_v27  ;;  %v767_v10 = vrot.slane %v766_v33, 2 }
 0x4b8   :  { %v762_v11 = vrot.slane %v761_v9, 1  ;;  %v768_v36 = vadd.f32 %v767_v10, %v766_v33 }
 0x4ba   :  { %v769_v12 = vrot.slane %v768_v36, 1  ;;  %v763_v14 = vadd.f32 %v762_v11, %v761_v9 }
 0x4bc   :  { %v770_v15 = vadd.f32 %v769_v12, %v768_v36 }
 0x4be   :  { %v771_v39 = vsel %vm316_vm4, %v763_v14, %v770_v15 }
 0x4bf   :  { %1117 = vmatmul.mubr.f32.vlgmr.msra.gmra.mrb[4].mxu0 %v771_v39 }
 0x592   :  { %v838_v42 = vpop.f32.mrb[4].mxu0 }
 0x593   :  { %v842_v16 = vmul.f32 0.0078125, %v838_v42  ;;  %v1118_v17 = vpop.f32.mrb[5].mxu0 }
 0x595   :  { %v843_v18 = vmul.f32 %v842_v16, %v842_v16 }
 0x597   :  { %v845_v20 = vrot.slane %v843_v18, 7 }
 0x599   :  { %v847_v22 = vsub.f32 %v842_v16, %v845_v20 }
 0x59b   :  { %v848_v23 = vmax.f32 %v847_v22, 0.0 }
 0x59d   :  { %v849_v25 = vadd.f32 1e-05, %v848_v23 }
 0x59f   :  { %1195 = vrsqrt.f32 %v849_v25 }
 0x5a9   :  { %v1196_v26 = vpop.eup %1195 }
 0x5aa   :  { %v851_v28 = vsel %vm316_vm4, %v842_v16, %v1196_v26 }
 0x5ab   :  { %1122 = vmatmul.mubr.msk.f32.vlgmr.msra.gmra.mrb[4].mxu1 %vm78_vm0, %v851_v28 }
 0x67e   :  { %v921_v29 = vpop.f32.mrb[4].mxu1 }
 0x67f   :  { %v928_v31 = vrot.slane %v921_v29, %v1277_v5  ;;  %v1123_v32 = vpop.f32.mrb[5].mxu1  ;;  %v933_v35 = vrot.slane %v921_v29, %v1285_v8 }
 0x681   :  { %v929_v34 = vsub.f32 %v751_v1, %v928_v31 }
 0x683   :  { %v934_v38 = vmul.f32 %v933_v35, %v929_v34 }
 0x685   :  { %v940_v40 = vmul.f32 %v938_v37, %v934_v38 }
 0x687   :  { %v946_v44 = vadd.f32 %v944_v41, %v940_v40 }
 0x689   :  { %947 = vst [vmem:[%s1473_s10] sm:$0xff] %v946_v44 }

</bundles_post_ra>
